<compile_context>
chip_gen: v7x
topology: tpu7x:2x2x1
jax: 0.10.0
libtpu: 0.0.40
codegen_flags: <defaults>
</compile_context>

<pallas_src>
import functools

import jax
import jax.numpy as jnp
from jax.experimental import pallas as pl
from jax.experimental.pallas import tpu as pltpu


def _loss_kernel(a_ref, p_ref, n_ref, preds_ref, lab_ref, labn_ref,
                 out_ref, acc_ref, *, margin, total_batch, use_mxu):
    """Gridded partial-sum kernel over batch-row tiles.

    Per grid step:
      a/p/n_ref    : (tb, D)     embedding tiles (native dtype, cast in-kernel)
      preds_ref    : (3, C, tb)  lane-dense logits tile (batch on lane axis)
      lab/labn_ref : (1, tb)     int32 1-indexed labels tile
      out_ref      : (1, 2)      SMEM -> [triplet_mean, softmax_mean]
      acc_ref      : (2,)        SMEM scratch accumulator (persists across grid)
    """
    i = pl.program_id(0)

    @pl.when(i == 0)
    def _init():
        acc_ref[0] = jnp.float32(0.0)
        acc_ref[1] = jnp.float32(0.0)

    a = a_ref[...].astype(jnp.float32)
    p = p_ref[...].astype(jnp.float32)
    n = n_ref[...].astype(jnp.float32)

    # --- triplet part (num_triplets == 0 fallback branch of the module) ---
    d_ap = a - p
    d_an = a - n
    if use_mxu:
        # Large D: fuse both row reductions into one MXU contraction with a
        # (D, 1) ones column, keeping the hot reduce off the XLU slots.
        diff = d_ap * d_ap - d_an * d_an                       # (tb, D) on VPU
        ones = jnp.ones((diff.shape[1], 1), jnp.float32)
        gap = jnp.dot(diff, ones, preferred_element_type=jnp.float32)  # (tb, 1)
    else:
        ap = jnp.sum(d_ap * d_ap, axis=1, keepdims=True)       # (tb, 1)
        an = jnp.sum(d_an * d_an, axis=1, keepdims=True)       # (tb, 1)
        gap = ap - an
    tl = jnp.maximum(gap + jnp.float32(margin), 0.0)           # F.relu
    acc_ref[0] += jnp.sum(tl)

    # --- softmax cross-entropy (nn.CrossEntropyLoss, mean reduction) ---
    # Lane-dense: each section is (C, tb) with batch on lanes, classes on
    # sublanes; target = cat(labels, labels, labels_neg) - 1 built in-kernel.
    num_classes = preds_ref.shape[1]
    tb = preds_ref.shape[2]
    lab0 = lab_ref[...] - 1                                    # (1, tb) 0-indexed
    labn0 = labn_ref[...] - 1
    cls = jax.lax.broadcasted_iota(jnp.int32, (num_classes, tb), 0)

    ce = jnp.float32(0.0)
    # sections: 0 = anchor rows (labels), 1 = pos rows (labels), 2 = neg rows
    for s, tgt in ((0, lab0), (1, lab0), (2, labn0)):
        lg = preds_ref[s].astype(jnp.float32)                  # (C, tb)
        m = jnp.max(lg, axis=0, keepdims=True)                 # (1, tb)
        lse = m + jnp.log(jnp.sum(jnp.exp(lg - m), axis=0, keepdims=True))
        true_logit = jnp.sum(jnp.where(cls == tgt, lg, 0.0), axis=0, keepdims=True)
        ce = ce + jnp.sum(lse - true_logit)
    acc_ref[1] += ce

    @pl.when(i == pl.num_programs(0) - 1)
    def _finalize():
        out_ref[0, 0] = acc_ref[0] / jnp.float32(total_batch)
        out_ref[0, 1] = acc_ref[1] / jnp.float32(3 * total_batch)


def _pick_tile(b):
    for t in (512, 256, 128):
        if b % t == 0:
            return t
    return b


def online_triplet_softmax_loss(anchor_embed, pos_embed, neg_embed,
                                preds, labels, labels_neg,
                                margin=0.0, lambda_factor=0.01):
    """Mirrors OnlineTripletSoftmaxLoss.forward -> (loss_total, triplet_mean, loss_softmax).

    Note: the reference forward returns loss_total == triplet_losses.mean();
    lambda_factor is unused in the PyTorch forward, so it is unused here too.
    """
    del lambda_factor  # unused in the reference forward as well

    b, d = anchor_embed.shape
    n_rows, c = preds.shape
    assert n_rows == 3 * b, "preds must have 3*batch rows (anchor|pos|neg)"

    # TODO(synk): triplet_selector.get_triplets is an external, data-dependent
    # miner; only the num_triplets == 0 fallback branch (row-wise anchor/pos/neg
    # distances) is implemented, which is the module's deterministic path.

    # Lane-dense logits layout: (3 sections, C classes, batch). Tiny wrapper
    # transpose (3B*C elements) buys dense lane utilization in the LSE path.
    preds_t = preds.reshape(3, b, c).transpose(0, 2, 1)        # (3, C, B)

    if labels.dtype != jnp.int32:
        labels = labels.astype(jnp.int32)
    if labels_neg.dtype != jnp.int32:
        labels_neg = labels_neg.astype(jnp.int32)
    labels_2d = labels.reshape(1, b)
    labels_neg_2d = labels_neg.reshape(1, b)

    tb = _pick_tile(b)
    grid = (b // tb,)

    kernel = functools.partial(
        _loss_kernel, margin=float(margin), total_batch=b, use_mxu=(d >= 256))

    out = pl.pallas_call(
        kernel,
        grid=grid,
        in_specs=[
            pl.BlockSpec((tb, d), lambda i: (i, 0)),           # anchor
            pl.BlockSpec((tb, d), lambda i: (i, 0)),           # pos
            pl.BlockSpec((tb, d), lambda i: (i, 0)),           # neg
            pl.BlockSpec((3, c, tb), lambda i: (0, 0, i)),     # preds (lane-dense)
            pl.BlockSpec((1, tb), lambda i: (0, i)),           # labels
            pl.BlockSpec((1, tb), lambda i: (0, i)),           # labels_neg
        ],
        out_specs=pl.BlockSpec((1, 2), lambda i: (0, 0),
                               memory_space=pltpu.MemorySpace.SMEM),
        out_shape=jax.ShapeDtypeStruct((1, 2), jnp.float32),
        scratch_shapes=[pltpu.SMEM((2,), jnp.float32)],
        compiler_params=pltpu.CompilerParams(
            dimension_semantics=("arbitrary",)),               # reduction axis
    )(anchor_embed, pos_embed, neg_embed, preds_t, labels_2d, labels_neg_2d)

    loss_total = out[0, 0]      # == triplet_losses.mean(), as in the reference
    loss_softmax = out[0, 1]
    return loss_total, loss_total, loss_softmax


if __name__ == "__main__":
    B, D, C = 8, 32, 4  # batch, embed_dim, num_classes

    key = jax.random.PRNGKey(0)
    k_a, k_p, k_n, k_pred, k_lab, k_labn = jax.random.split(key, 6)

    anchor = jax.random.normal(k_a, (B, D), dtype=jnp.float32)
    pos = jax.random.normal(k_p, (B, D), dtype=jnp.float32)
    neg = jax.random.normal(k_n, (B, D), dtype=jnp.float32)
    preds = jax.random.normal(k_pred, (3 * B, C), dtype=jnp.float32)
    labels = jax.random.randint(k_lab, (B,), 1, C + 1, dtype=jnp.int32)       # 1-indexed
    labels_neg = jax.random.randint(k_labn, (B,), 1, C + 1, dtype=jnp.int32)  # 1-indexed

    loss_total, triplet_mean, loss_softmax = online_triplet_softmax_loss(
        anchor, pos, neg, preds, labels, labels_neg, margin=0.0)
    loss_total, triplet_mean, loss_softmax = jax.block_until_ready(
        (loss_total, triplet_mean, loss_softmax))

    # lightweight sanity check against plain-JAX reference
    ap = jnp.sum((anchor - pos) ** 2, axis=1)
    an = jnp.sum((anchor - neg) ** 2, axis=1)
    ref_triplet = jnp.mean(jnp.maximum(ap - an + 0.0, 0.0))
    tgt = jnp.concatenate([labels, labels, labels_neg]) - 1
    logz = jax.nn.logsumexp(preds, axis=1)
    ref_ce = jnp.mean(logz - preds[jnp.arange(3 * B), tgt])
    assert jnp.allclose(loss_total, ref_triplet, atol=1e-5), (loss_total, ref_triplet)
    assert jnp.allclose(triplet_mean, ref_triplet, atol=1e-5), (triplet_mean, ref_triplet)
    assert jnp.allclose(loss_softmax, ref_ce, atol=1e-5), (loss_softmax, ref_ce)

    print("KERNEL_OK")
</pallas_src>

<mosaic_0001>
module attributes {stable_mosaic.version = 11 : i64} {
  func.func @_loss_kernel(%arg0: i32, %arg1: memref<8x32xf32, #tpu.memory_space<vmem>>, %arg2: memref<8x32xf32, #tpu.memory_space<vmem>>, %arg3: memref<8x32xf32, #tpu.memory_space<vmem>>, %arg4: memref<3x4x8xf32, #tpu.memory_space<vmem>>, %arg5: memref<1x8xi32, #tpu.memory_space<vmem>>, %arg6: memref<1x8xi32, #tpu.memory_space<vmem>>, %arg7: memref<1x2xf32, #tpu.memory_space<smem>>, %arg8: memref<2xf32, #tpu.memory_space<smem>>) attributes {dimension_semantics = [#tpu.dimension_semantics<arbitrary>], iteration_bounds = array<i64: 1>, scalar_prefetch = 0 : i64, scratch_operands = 1 : i64, tpu.core_type = #tpu.core_type<tc>, window_params = [{transform_indices = @transform_0, window_bounds = array<i64: 8, 32>}, {transform_indices = @transform_1, window_bounds = array<i64: 8, 32>}, {transform_indices = @transform_2, window_bounds = array<i64: 8, 32>}, {transform_indices = @transform_3, window_bounds = array<i64: 3, 4, 8>}, {transform_indices = @transform_4, window_bounds = array<i64: 1, 8>}, {transform_indices = @transform_5, window_bounds = array<i64: 1, 8>}, {transform_indices = @transform_6, window_bounds = array<i64: 1, 2>}]} {
    %c0_i32 = arith.constant 0 : i32
    %0 = arith.cmpi eq, %arg0, %c0_i32 : i32
    %1 = arith.extui %0 : i1 to i32
    %c0_i32_0 = arith.constant 0 : i32
    %2 = arith.cmpi ne, %1, %c0_i32_0 : i32
    scf.if %2 {
      %cst_44 = arith.constant 0.000000e+00 : f32
      %c0_45 = arith.constant 0 : index
      %108 = memref.load %arg8[%c0_45] : memref<2xf32, #tpu.memory_space<smem>>
      memref.store %cst_44, %arg8[%c0_45] : memref<2xf32, #tpu.memory_space<smem>>
      %cst_46 = arith.constant 0.000000e+00 : f32
      %c1_47 = arith.constant 1 : index
      %109 = memref.load %arg8[%c1_47] : memref<2xf32, #tpu.memory_space<smem>>
      memref.store %cst_46, %arg8[%c1_47] : memref<2xf32, #tpu.memory_space<smem>>
    } else {
    }
    %c0 = arith.constant 0 : index
    %c0_1 = arith.constant 0 : index
    %3 = vector.load %arg1[%c0, %c0_1] : memref<8x32xf32, #tpu.memory_space<vmem>>, vector<8x32xf32>
    %c0_2 = arith.constant 0 : index
    %c0_3 = arith.constant 0 : index
    %4 = vector.load %arg2[%c0_2, %c0_3] : memref<8x32xf32, #tpu.memory_space<vmem>>, vector<8x32xf32>
    %c0_4 = arith.constant 0 : index
    %c0_5 = arith.constant 0 : index
    %5 = vector.load %arg3[%c0_4, %c0_5] : memref<8x32xf32, #tpu.memory_space<vmem>>, vector<8x32xf32>
    %6 = arith.subf %3, %4 : vector<8x32xf32>
    %7 = arith.subf %3, %5 : vector<8x32xf32>
    %8 = arith.mulf %6, %6 : vector<8x32xf32>
    %cst = arith.constant dense<0.000000e+00> : vector<8xf32>
    %9 = vector.multi_reduction <add>, %8, %cst [1] : vector<8x32xf32> to vector<8xf32>
    %10 = vector.shape_cast %9 : vector<8xf32> to vector<8x1xf32>
    %11 = arith.mulf %7, %7 : vector<8x32xf32>
    %cst_6 = arith.constant dense<0.000000e+00> : vector<8xf32>
    %12 = vector.multi_reduction <add>, %11, %cst_6 [1] : vector<8x32xf32> to vector<8xf32>
    %13 = vector.shape_cast %12 : vector<8xf32> to vector<8x1xf32>
    %14 = arith.subf %10, %13 : vector<8x1xf32>
    %cst_7 = arith.constant 0.000000e+00 : f32
    %15 = vector.broadcast %cst_7 : f32 to vector<8x1xf32>
    %16 = arith.addf %14, %15 : vector<8x1xf32>
    %cst_8 = arith.constant 0.000000e+00 : f32
    %17 = vector.broadcast %cst_8 : f32 to vector<8x1xf32>
    %18 = arith.maximumf %16, %17 : vector<8x1xf32>
    %c0_9 = arith.constant 0 : index
    %19 = memref.load %arg8[%c0_9] : memref<2xf32, #tpu.memory_space<smem>>
    %20 = vector.shape_cast %18 : vector<8x1xf32> to vector<1x8x1xf32>
    %cst_10 = arith.constant dense<0.000000e+00> : vector<1xf32>
    %21 = vector.multi_reduction <add>, %20, %cst_10 [1, 2] : vector<1x8x1xf32> to vector<1xf32>
    %22 = vector.shape_cast %21 : vector<1xf32> to vector<1x1x1xf32>
    %23 = vector.extract %22[0, 0, 0] : f32 from vector<1x1x1xf32>
    %24 = arith.addf %19, %23 : f32
    %c0_11 = arith.constant 0 : index
    %25 = memref.load %arg8[%c0_11] : memref<2xf32, #tpu.memory_space<smem>>
    memref.store %24, %arg8[%c0_11] : memref<2xf32, #tpu.memory_space<smem>>
    %c0_12 = arith.constant 0 : index
    %c0_13 = arith.constant 0 : index
    %26 = vector.load %arg5[%c0_12, %c0_13] : memref<1x8xi32, #tpu.memory_space<vmem>>, vector<1x8xi32>
    %c1_i32 = arith.constant 1 : i32
    %27 = vector.broadcast %c1_i32 : i32 to vector<1x8xi32>
    %28 = arith.subi %26, %27 : vector<1x8xi32>
    %c0_14 = arith.constant 0 : index
    %c0_15 = arith.constant 0 : index
    %29 = vector.load %arg6[%c0_14, %c0_15] : memref<1x8xi32, #tpu.memory_space<vmem>>, vector<1x8xi32>
    %c1_i32_16 = arith.constant 1 : i32
    %30 = vector.broadcast %c1_i32_16 : i32 to vector<1x8xi32>
    %31 = arith.subi %29, %30 : vector<1x8xi32>
    %32 = tpu.iota {dimensions = array<i32: 0>} : vector<4x8xi32>
    %c0_17 = arith.constant 0 : index
    %c0_18 = arith.constant 0 : index
    %c0_19 = arith.constant 0 : index
    %33 = vector.load %arg4[%c0_17, %c0_18, %c0_19] : memref<3x4x8xf32, #tpu.memory_space<vmem>>, vector<1x4x8xf32>
    %34 = vector.shape_cast %33 : vector<1x4x8xf32> to vector<4x8xf32>
    %cst_20 = arith.constant dense<0xFF800000> : vector<8xf32>
    %35 = vector.multi_reduction <maximumf>, %34, %cst_20 [0] : vector<4x8xf32> to vector<8xf32>
    %36 = vector.shape_cast %35 : vector<8xf32> to vector<1x8xf32>
    %37 = vector.broadcast %36 : vector<1x8xf32> to vector<4x8xf32>
    %38 = arith.subf %34, %37 : vector<4x8xf32>
    %39 = math.exp %38 : vector<4x8xf32>
    %cst_21 = arith.constant dense<0.000000e+00> : vector<8xf32>
    %40 = vector.multi_reduction <add>, %39, %cst_21 [0] : vector<4x8xf32> to vector<8xf32>
    %41 = vector.shape_cast %40 : vector<8xf32> to vector<1x8xf32>
    %42 = math.log %41 : vector<1x8xf32>
    %43 = arith.addf %36, %42 : vector<1x8xf32>
    %44 = vector.broadcast %28 : vector<1x8xi32> to vector<4x8xi32>
    %45 = arith.cmpi eq, %32, %44 : vector<4x8xi32>
    %cst_22 = arith.constant 0.000000e+00 : f32
    %46 = vector.broadcast %cst_22 : f32 to vector<4x8xf32>
    %47 = arith.select %45, %34, %46 : vector<4x8xi1>, vector<4x8xf32>
    %cst_23 = arith.constant dense<0.000000e+00> : vector<8xf32>
    %48 = vector.multi_reduction <add>, %47, %cst_23 [0] : vector<4x8xf32> to vector<8xf32>
    %49 = vector.shape_cast %48 : vector<8xf32> to vector<1x8xf32>
    %50 = arith.subf %43, %49 : vector<1x8xf32>
    %51 = vector.shape_cast %50 : vector<1x8xf32> to vector<1x1x8xf32>
    %cst_24 = arith.constant dense<0.000000e+00> : vector<1xf32>
    %52 = vector.multi_reduction <add>, %51, %cst_24 [1, 2] : vector<1x1x8xf32> to vector<1xf32>
    %53 = vector.shape_cast %52 : vector<1xf32> to vector<1x1x1xf32>
    %54 = vector.extract %53[0, 0, 0] : f32 from vector<1x1x1xf32>
    %cst_25 = arith.constant 0.000000e+00 : f32
    %55 = arith.addf %cst_25, %54 : f32
    %c1 = arith.constant 1 : index
    %c0_26 = arith.constant 0 : index
    %c0_27 = arith.constant 0 : index
    %56 = vector.load %arg4[%c1, %c0_26, %c0_27] : memref<3x4x8xf32, #tpu.memory_space<vmem>>, vector<1x4x8xf32>
    %57 = vector.shape_cast %56 : vector<1x4x8xf32> to vector<4x8xf32>
    %cst_28 = arith.constant dense<0xFF800000> : vector<8xf32>
    %58 = vector.multi_reduction <maximumf>, %57, %cst_28 [0] : vector<4x8xf32> to vector<8xf32>
    %59 = vector.shape_cast %58 : vector<8xf32> to vector<1x8xf32>
    %60 = vector.broadcast %59 : vector<1x8xf32> to vector<4x8xf32>
    %61 = arith.subf %57, %60 : vector<4x8xf32>
    %62 = math.exp %61 : vector<4x8xf32>
    %cst_29 = arith.constant dense<0.000000e+00> : vector<8xf32>
    %63 = vector.multi_reduction <add>, %62, %cst_29 [0] : vector<4x8xf32> to vector<8xf32>
    %64 = vector.shape_cast %63 : vector<8xf32> to vector<1x8xf32>
    %65 = math.log %64 : vector<1x8xf32>
    %66 = arith.addf %59, %65 : vector<1x8xf32>
    %67 = vector.broadcast %28 : vector<1x8xi32> to vector<4x8xi32>
    %68 = arith.cmpi eq, %32, %67 : vector<4x8xi32>
    %cst_30 = arith.constant 0.000000e+00 : f32
    %69 = vector.broadcast %cst_30 : f32 to vector<4x8xf32>
    %70 = arith.select %68, %57, %69 : vector<4x8xi1>, vector<4x8xf32>
    %cst_31 = arith.constant dense<0.000000e+00> : vector<8xf32>
    %71 = vector.multi_reduction <add>, %70, %cst_31 [0] : vector<4x8xf32> to vector<8xf32>
    %72 = vector.shape_cast %71 : vector<8xf32> to vector<1x8xf32>
    %73 = arith.subf %66, %72 : vector<1x8xf32>
    %74 = vector.shape_cast %73 : vector<1x8xf32> to vector<1x1x8xf32>
    %cst_32 = arith.constant dense<0.000000e+00> : vector<1xf32>
    %75 = vector.multi_reduction <add>, %74, %cst_32 [1, 2] : vector<1x1x8xf32> to vector<1xf32>
    %76 = vector.shape_cast %75 : vector<1xf32> to vector<1x1x1xf32>
    %77 = vector.extract %76[0, 0, 0] : f32 from vector<1x1x1xf32>
    %78 = arith.addf %55, %77 : f32
    %c2 = arith.constant 2 : index
    %c0_33 = arith.constant 0 : index
    %c0_34 = arith.constant 0 : index
    %79 = vector.load %arg4[%c2, %c0_33, %c0_34] : memref<3x4x8xf32, #tpu.memory_space<vmem>>, vector<1x4x8xf32>
    %80 = vector.shape_cast %79 : vector<1x4x8xf32> to vector<4x8xf32>
    %cst_35 = arith.constant dense<0xFF800000> : vector<8xf32>
    %81 = vector.multi_reduction <maximumf>, %80, %cst_35 [0] : vector<4x8xf32> to vector<8xf32>
    %82 = vector.shape_cast %81 : vector<8xf32> to vector<1x8xf32>
    %83 = vector.broadcast %82 : vector<1x8xf32> to vector<4x8xf32>
    %84 = arith.subf %80, %83 : vector<4x8xf32>
    %85 = math.exp %84 : vector<4x8xf32>
    %cst_36 = arith.constant dense<0.000000e+00> : vector<8xf32>
    %86 = vector.multi_reduction <add>, %85, %cst_36 [0] : vector<4x8xf32> to vector<8xf32>
    %87 = vector.shape_cast %86 : vector<8xf32> to vector<1x8xf32>
    %88 = math.log %87 : vector<1x8xf32>
    %89 = arith.addf %82, %88 : vector<1x8xf32>
    %90 = vector.broadcast %31 : vector<1x8xi32> to vector<4x8xi32>
    %91 = arith.cmpi eq, %32, %90 : vector<4x8xi32>
    %cst_37 = arith.constant 0.000000e+00 : f32
    %92 = vector.broadcast %cst_37 : f32 to vector<4x8xf32>
    %93 = arith.select %91, %80, %92 : vector<4x8xi1>, vector<4x8xf32>
    %cst_38 = arith.constant dense<0.000000e+00> : vector<8xf32>
    %94 = vector.multi_reduction <add>, %93, %cst_38 [0] : vector<4x8xf32> to vector<8xf32>
    %95 = vector.shape_cast %94 : vector<8xf32> to vector<1x8xf32>
    %96 = arith.subf %89, %95 : vector<1x8xf32>
    %97 = vector.shape_cast %96 : vector<1x8xf32> to vector<1x1x8xf32>
    %cst_39 = arith.constant dense<0.000000e+00> : vector<1xf32>
    %98 = vector.multi_reduction <add>, %97, %cst_39 [1, 2] : vector<1x1x8xf32> to vector<1xf32>
    %99 = vector.shape_cast %98 : vector<1xf32> to vector<1x1x1xf32>
    %100 = vector.extract %99[0, 0, 0] : f32 from vector<1x1x1xf32>
    %101 = arith.addf %78, %100 : f32
    %c1_40 = arith.constant 1 : index
    %102 = memref.load %arg8[%c1_40] : memref<2xf32, #tpu.memory_space<smem>>
    %103 = arith.addf %102, %101 : f32
    %c1_41 = arith.constant 1 : index
    %104 = memref.load %arg8[%c1_41] : memref<2xf32, #tpu.memory_space<smem>>
    memref.store %103, %arg8[%c1_41] : memref<2xf32, #tpu.memory_space<smem>>
    %c0_i32_42 = arith.constant 0 : i32
    %105 = arith.cmpi eq, %arg0, %c0_i32_42 : i32
    %106 = arith.extui %105 : i1 to i32
    %c0_i32_43 = arith.constant 0 : i32
    %107 = arith.cmpi ne, %106, %c0_i32_43 : i32
    scf.if %107 {
      %c0_44 = arith.constant 0 : index
      %108 = memref.load %arg8[%c0_44] : memref<2xf32, #tpu.memory_space<smem>>
      %cst_45 = arith.constant 8.000000e+00 : f32
      %109 = arith.divf %108, %cst_45 : f32
      %c0_46 = arith.constant 0 : index
      %c0_47 = arith.constant 0 : index
      %110 = memref.load %arg7[%c0_46, %c0_47] : memref<1x2xf32, #tpu.memory_space<smem>>
      memref.store %109, %arg7[%c0_46, %c0_47] : memref<1x2xf32, #tpu.memory_space<smem>>
      %c1_48 = arith.constant 1 : index
      %111 = memref.load %arg8[%c1_48] : memref<2xf32, #tpu.memory_space<smem>>
      %cst_49 = arith.constant 2.400000e+01 : f32
      %112 = arith.divf %111, %cst_49 : f32
      %c0_50 = arith.constant 0 : index
      %c1_51 = arith.constant 1 : index
      %113 = memref.load %arg7[%c0_50, %c1_51] : memref<1x2xf32, #tpu.memory_space<smem>>
      memref.store %112, %arg7[%c0_50, %c1_51] : memref<1x2xf32, #tpu.memory_space<smem>>
    } else {
    }
    return
  }
  func.func @transform_0(%arg0: i32) -> (i32, i32) {
    %c0_i32 = arith.constant 0 : i32
    %c0_i32_0 = arith.constant 0 : i32
    return %arg0, %c0_i32 : i32, i32
  }
  func.func @transform_1(%arg0: i32) -> (i32, i32) {
    %c0_i32 = arith.constant 0 : i32
    %c0_i32_0 = arith.constant 0 : i32
    return %arg0, %c0_i32 : i32, i32
  }
  func.func @transform_2(%arg0: i32) -> (i32, i32) {
    %c0_i32 = arith.constant 0 : i32
    %c0_i32_0 = arith.constant 0 : i32
    return %arg0, %c0_i32 : i32, i32
  }
  func.func @transform_3(%arg0: i32) -> (i32, i32, i32) {
    %c0_i32 = arith.constant 0 : i32
    %c0_i32_0 = arith.constant 0 : i32
    %c0_i32_1 = arith.constant 0 : i32
    return %c0_i32, %c0_i32_0, %arg0 : i32, i32, i32
  }
  func.func @transform_4(%arg0: i32) -> (i32, i32) {
    %c0_i32 = arith.constant 0 : i32
    %c0_i32_0 = arith.constant 0 : i32
    return %c0_i32, %arg0 : i32, i32
  }
  func.func @transform_5(%arg0: i32) -> (i32, i32) {
    %c0_i32 = arith.constant 0 : i32
    %c0_i32_0 = arith.constant 0 : i32
    return %c0_i32, %arg0 : i32, i32
  }
  func.func @transform_6(%arg0: i32) -> (i32, i32) {
    %c0_i32 = arith.constant 0 : i32
    %c0_i32_0 = arith.constant 0 : i32
    %c0_i32_1 = arith.constant 0 : i32
    return %c0_i32, %c0_i32_0 : i32, i32
  }
}

</mosaic_0001>

<bundles_post_ra>
// kernel: tpu_custom_call.1
= control target key start
LH: loop header
LB: loop body
LE: loop exit
PB: predicated region body
PF: predicated region fallthrough
CT: control target
= control target key end

     0   :  { %11 = vsyncpa [#allocation4], 0  ;;  %s564_s0 = inlined_call_operand.hbm [shape: f32[8,32], index: 0, kind: input, shape index: {}]   ;;  %s565_s1 = inlined_call_operand.hbm [shape: f32[8,32], index: 1, kind: input, shape index: {}]   ;;  %s566_s2 = inlined_call_operand.hbm [shape: f32[8,32], index: 2, kind: input, shape index: {}]   ;;  %s567_s3 = inlined_call_operand.hbm [shape: f32[3,4,8], index: 3, kind: input, shape index: {}]   ;;  %s568_s4 = inlined_call_operand.vmem [shape: s32[1,8], index: 4, kind: input, shape index: {}]   ;;  %s569_s5 = inlined_call_operand.vmem [shape: s32[1,8], index: 5, kind: input, shape index: {}]   ;;  %s570_s6 = inlined_call_operand.hbm [shape: f32[1,2], index: 6, kind: output, shape index: {}]  }
   0x1   :  { %12 = vsyncpa [#allocation7], 0 }
   0x2   :  { %13 = vsyncpa [#allocation10], 0 }
   0x3   :  { %14 = vsyncpa [#allocation5], 0  ;;  %s428_s21 = smov [#allocation6]   ;;  %s429_s23 = smov [#allocation3]  }
   0x4   :  { %s31_s22 = sshll.u32 %s428_s21, 4  ;;  %s21_s24 = sshll.u32 %s429_s23, 4  ;;  %s32_s22 = int_to_ptr.vmem [resolvable:$true] %s31_s22  ;;  %s22_s24 = int_to_ptr.vmem [resolvable:$true] %s21_s24 }
   0x5   :  { %s322_s27 = scalar_lea.hbm %s565_s1, 128 }
   0x6   :  { %p323_p0 = scmp.ne.s32.totalorder %s565_s1, %s322_s27  ;;  %p326_p1 = scmp.lt.u32.totalorder %s322_s27, %s565_s1 }
   0x8   :  { %p328_p2 = pnand %p326_p1, %p323_p0 }
   0xa   :  { %331 = shalt.err (!%p328_p2)
}
   0xb   :  { %s332_s8 = scalar_lea.vmem %s32_s22, 128  ;;  %p337_p4 = scmp.lt.s32.totalorder %s32_s22, %s32_s22 }
   0xc   :  { %p333_p3 = scmp.ne.s32.totalorder %s32_s22, %s332_s8  ;;  %p338_p5 = scmp.lt.s32.totalorder %s332_s8, %s332_s8 }
   0xe   :  { %p339_p6 = por %p338_p5, %p337_p4 }
  0x10   :  { %p340_p7 = pnand %p339_p6, %p333_p3 }
  0x12   :  { %343 = shalt.err (!%p340_p7)
}
  0x13   :  { %34 = dma.hbm_to_vmem [thread:$0]  %s565_s1, 128, %s32_s22, [#allocation7]  }
  0x14   :  { %s344_s13 = scalar_lea.hbm %s564_s0, 128 }
  0x15   :  { %p345_p8 = scmp.ne.s32.totalorder %s564_s0, %s344_s13  ;;  %p348_p9 = scmp.lt.u32.totalorder %s344_s13, %s564_s0 }
  0x17   :  { %p350_p10 = pnand %p348_p9, %p345_p8 }
  0x19   :  { %353 = shalt.err (!%p350_p10)
}
  0x1a   :  { %s354_s18 = scalar_lea.vmem %s22_s24, 128  ;;  %p359_p12 = scmp.lt.s32.totalorder %s22_s24, %s22_s24 }
  0x1b   :  { %p355_p11 = scmp.ne.s32.totalorder %s22_s24, %s354_s18  ;;  %p360_p13 = scmp.lt.s32.totalorder %s354_s18, %s354_s18 }
  0x1d   :  { %p361_p0 = por %p360_p13, %p359_p12 }
  0x1f   :  { %p362_p1 = pnand %p361_p0, %p355_p11 }
  0x21   :  { %365 = shalt.err (!%p362_p1)
}
  0x22   :  { %24 = dma.hbm_to_vmem [thread:$0]  %s564_s0, 128, %s22_s24, [#allocation4]  }
  0x23   :  { %s430_s20 = smov [#allocation8]   ;;  %s431_s22 = smov [#allocation9]  }
  0x24   :  { %s41_s21 = sshll.u32 %s430_s20, 4  ;;  %s50_s23 = sshll.u32 %s431_s22, 4  ;;  %s42_s21 = int_to_ptr.vmem [resolvable:$true] %s41_s21  ;;  %s494_s23 = int_to_ptr.vmem [resolvable:$true] %s50_s23 }
  0x25   :  { %s366_s27 = scalar_lea.hbm %s566_s2, 128 }
  0x26   :  { %p367_p2 = scmp.ne.s32.totalorder %s566_s2, %s366_s27  ;;  %p370_p3 = scmp.lt.u32.totalorder %s366_s27, %s566_s2 }
  0x28   :  { %p372_p4 = pnand %p370_p3, %p367_p2 }
  0x2a   :  { %375 = shalt.err (!%p372_p4)
}
  0x2b   :  { %s376_s0 = scalar_lea.vmem %s42_s21, 128  ;;  %p381_p6 = scmp.lt.s32.totalorder %s42_s21, %s42_s21 }
  0x2c   :  { %p377_p5 = scmp.ne.s32.totalorder %s42_s21, %s376_s0  ;;  %p382_p7 = scmp.lt.s32.totalorder %s376_s0, %s376_s0 }
  0x2e   :  { %p383_p8 = por %p382_p7, %p381_p6 }
  0x30   :  { %p384_p9 = pnand %p383_p8, %p377_p5 }
  0x32   :  { %387 = shalt.err (!%p384_p9)
}
  0x33   :  { %44 = dma.hbm_to_vmem [thread:$0]  %s566_s2, 128, %s42_s21, [#allocation7]  }
  0x34   :  { %s388_s11 = scalar_lea.hbm %s567_s3, 192 }
  0x35   :  { %p389_p10 = scmp.ne.s32.totalorder %s567_s3, %s388_s11  ;;  %p392_p11 = scmp.lt.u32.totalorder %s388_s11, %s567_s3 }
  0x37   :  { %p394_p12 = pnand %p392_p11, %p389_p10 }
  0x39   :  { %397 = shalt.err (!%p394_p12)
}
  0x3a   :  { %s398_s16 = scalar_lea.vmem %s494_s23, 192  ;;  %p403_p0 = scmp.lt.s32.totalorder %s494_s23, %s494_s23 }
  0x3b   :  { %p399_p13 = scmp.ne.s32.totalorder %s494_s23, %s398_s16  ;;  %p404_p1 = scmp.lt.s32.totalorder %s398_s16, %s398_s16 }
  0x3d   :  { %p405_p2 = por %p404_p1, %p403_p0 }
  0x3f   :  { %p406_p3 = pnand %p405_p2, %p399_p13 }
  0x41   :  { %409 = shalt.err (!%p406_p3)
}
  0x42   :  { %s432_s2 = smov 64   ;;  %s433_s17 = smov 4  }
  0x43   :  { %56 = dma.hbm_to_vmem [thread:$0]  %s567_s3, 192, %s494_s23, [#allocation10], %s432_s2, %s432_s2, %s433_s17  }
  0x44   :  { %420 = dma.done.wait [#allocation4], 128  }
  0x45   :  { %421 = vsyncadd [#allocation4], 4294967168 }
  0x46   :  { %422 = dma.done.wait [#allocation7], 256  }
  0x47   :  { %423 = vsyncadd [#allocation7], 4294967040 }
  0x48   :  { %424 = dma.done.wait [#allocation10], 192  }
  0x49   :  { %425 = vsyncadd [#allocation10], 4294967104  ;;  %vm120_vm0 = vcmask 60416   ;;  %v81_v0 = vld [vmem:[#allocation3] sm:$0xff]  ;;  %v82_v1 = vld [vmem:[#allocation6] sm:$0xff]  ;;  %vm87_vm1 = vcmask 261120   ;;  %v117_v7 = vlaneseq }
  0x4a   :  { %v83_v2 = vld [vmem:[#allocation8] sm:$0xff]  ;;  %v84_v3 = vsub.f32 %v81_v0, %v82_v1  ;;  %v119_v5 = vld [vmem:[#allocation9] sm:$0xf]  ;;  %v168_v6 = vld [vmem:[#allocation9 + $0x4] sm:$0xf]  ;;  %vm155_vm4 = vcmask 57344  }
  0x4b   :  { %v85_v4 = vsub.f32 %v81_v0, %v83_v2  ;;  %v121_v8 = vsel %vm120_vm0, %v119_v5, -inf  ;;  %v169_v9 = vsel %vm120_vm0, %v168_v6, -inf  ;;  %v210_v10 = vld [vmem:[#allocation9 + $0x8] sm:$0xf]  ;;  %v118_v21 = vshrl.u32 %v117_v7, 7  ;;  %s410_s7 = scalar_lea.hbm %s570_s6, 16 }
  0x4c   :  { %v86_v11 = vmul.f32 %v84_v3, %v84_v3  ;;  %v122_v13 = vrot.slane %v121_v8, 4  ;;  %v170_v14 = vrot.slane %v169_v9, 4  ;;  %v211_v15 = vsel %vm120_vm0, %v210_v10, -inf  ;;  %v115_v27 = vld [vmem:[%s569_s5] sm:$0x1]  ;;  %p411_p4 = scmp.ne.s32.totalorder %s570_s6, %s410_s7  ;;  %p414_p5 = scmp.lt.u32.totalorder %s410_s7, %s570_s6 }
  0x4d   :  { %v91_v12 = vmul.f32 %v85_v4, %v85_v4  ;;  %v212_v19 = vrot.slane %v211_v15, 4  ;;  %v143_v30 = vsub.s32 0, %v118_v21  ;;  %v292_v32 = vadd.s32 4294967295, %v115_v27  ;;  %v113_v37 = vld [vmem:[%s568_s4] sm:$0x1] }
  0x4e   :  { %v88_v16 = vsel %vm87_vm1, %v86_v11, 0.0  ;;  %v123_v17 = vmax.f32 %v121_v8, %v122_v13  ;;  %v171_v18 = vmax.f32 %v169_v9, %v170_v14  ;;  %v291_v43 = vadd.s32 4294967295, %v113_v37  ;;  %p416_p6 = pnand %p414_p5, %p411_p4 }
  0x4f   :  { %89 = vadd.xlane.f32.xlu0 %v88_v16  ;;  %v92_v20 = vsel %vm87_vm1, %v91_v12, 0.0  ;;  %v213_v24 = vmax.f32 %v211_v15, %v212_v19  ;;  %v234_v36 = vrot.slane %v292_v32, %v143_v30  ;;  %vm99_vm5 = vcmask 7168  }
  0x50   :  { %v124_v22 = vrot.slane %v123_v17, 2  ;;  %v172_v23 = vrot.slane %v171_v18, 2  ;;  %v144_v49 = vrot.slane %v291_v43, %v143_v30 }
  0x51   :  { %v214_v28 = vrot.slane %v213_v24, 2  ;;  %vm235_vm2 = vcmp.eq.s32.totalorder %v118_v21, %v234_v36 }
  0x52   :  { %v125_v25 = vmax.f32 %v123_v17, %v124_v22  ;;  %v173_v26 = vmax.f32 %v171_v18, %v172_v23  ;;  %v236_v42 = vsel %vm235_vm2, %v210_v10, 0.0  ;;  %vm145_vm3 = vcmp.eq.s32.totalorder %v118_v21, %v144_v49 }
  0x53   :  { %93 = vadd.xlane.f32.xlu0 %v92_v20  ;;  %v215_v33 = vmax.f32 %v213_v24, %v214_v28  ;;  %v237_v46 = vsel %vm120_vm0, %v236_v42, 0.0  ;;  %v146_v50 = vsel %vm145_vm3, %v119_v5, 0.0  ;;  %v189_v52 = vsel %vm145_vm3, %v168_v6, 0.0 }
  0x54   :  { %v126_v29 = vrot.slane %v125_v25, 1  ;;  %v174_v31 = vrot.slane %v173_v26, 1  ;;  %v147_v56 = vsel %vm120_vm0, %v146_v50, 0.0  ;;  %v190_v60 = vsel %vm120_vm0, %v189_v52, 0.0 }
  0x55   :  { %v216_v38 = vrot.slane %v215_v33, 1  ;;  %v148_v63 = vrot.slane %v147_v56, 4  ;;  %v191_v3 = vrot.slane %v190_v60, 4  ;;  %v238_v7 = vrot.slane %v237_v46, 4 }
  0x56   :  { %v531_v34 = vmax.f32 %v125_v25, %v126_v29  ;;  %v533_v35 = vmax.f32 %v173_v26, %v174_v31 }
  0x57   :  { %v540_v41 = vmax.f32 %v215_v33, %v216_v38  ;;  %v149_v8 = vadd.f32 %v148_v63, %v147_v56  ;;  %v192_v12 = vadd.f32 %v191_v3, %v190_v60  ;;  %v239_v16 = vadd.f32 %v238_v7, %v237_v46 }
  0x58   :  { %v128_v39 = vsub.f32 %v119_v5, %v531_v34  ;;  %v176_v40 = vsub.f32 %v168_v6, %v533_v35 }
  0x59   :  { %v218_v47 = vsub.f32 %v210_v10, %v540_v41  ;;  %v150_v17 = vrot.slane %v149_v8, 2  ;;  %v193_v20 = vrot.slane %v192_v12, 2  ;;  %v240_v22 = vrot.slane %v239_v16, 2 }
  0x5a   :  { %v129_v44 = vmul.f32 1.442695, %v128_v39  ;;  %v177_v45 = vmul.f32 1.442695, %v176_v40 }
  0x5b   :  { %v219_v48 = vmul.f32 1.442695, %v218_v47  ;;  %v151_v23 = vadd.f32 %v150_v17, %v149_v8  ;;  %v194_v24 = vadd.f32 %v193_v20, %v192_v12  ;;  %v241_v25 = vadd.f32 %v240_v22, %v239_v16 }
  0x5c   :  { %310 = vpow2.f32 %v129_v44 }
  0x5d   :  { %312 = vpow2.f32 %v177_v45  ;;  %v152_v26 = vrot.slane %v151_v23, 1  ;;  %v195_v27 = vrot.slane %v194_v24, 1  ;;  %v242_v29 = vrot.slane %v241_v25, 1 }
  0x5e   :  { %314 = vpow2.f32 %v219_v48 }
  0x5f   :  { %v153_v32 = vadd.f32 %v152_v26, %v151_v23  ;;  %v196_v36 = vadd.f32 %v195_v27, %v194_v24  ;;  %v243_v42 = vadd.f32 %v242_v29, %v241_v25 }
  0x66   :  { %v311_v51 = vpop.eup %310 }
  0x67   :  { %v313_v53 = vpop.eup %312  ;;  %v131_v54 = vsel %vm120_vm0, %v311_v51, 0.0 }
  0x68   :  { %v132_v55 = vrot.slane %v131_v54, 4  ;;  %v179_v57 = vsel %vm120_vm0, %v313_v53, 0.0  ;;  %v315_v58 = vpop.eup %314 }
  0x69   :  { %v180_v59 = vrot.slane %v179_v57, 4  ;;  %v221_v62 = vsel %vm120_vm0, %v315_v58, 0.0 }
  0x6a   :  { %v133_v61 = vadd.f32 %v132_v55, %v131_v54  ;;  %v222_v1 = vrot.slane %v221_v62, 4 }
  0x6b   :  { %v181_v0 = vadd.f32 %v180_v59, %v179_v57 }
  0x6c   :  { %v134_v2 = vrot.slane %v133_v61, 2  ;;  %v223_v5 = vadd.f32 %v222_v1, %v221_v62 }
  0x6d   :  { %v182_v4 = vrot.slane %v181_v0, 2 }
  0x6e   :  { %v135_v6 = vadd.f32 %v134_v2, %v133_v61  ;;  %v224_v10 = vrot.slane %v223_v5, 2 }
  0x6f   :  { %v183_v9 = vadd.f32 %v182_v4, %v181_v0 }
  0x70   :  { %v136_v11 = vrot.slane %v135_v6, 1  ;;  %v225_v14 = vadd.f32 %v224_v10, %v223_v5 }
  0x71   :  { %v184_v13 = vrot.slane %v183_v9, 1 }
  0x72   :  { %v137_v15 = vadd.f32 %v136_v11, %v135_v6  ;;  %v226_v19 = vrot.slane %v225_v14, 1 }
  0x73   :  { %v185_v18 = vadd.f32 %v184_v13, %v183_v9 }
  0x74   :  { %316 = vlog2.f32 %v137_v15  ;;  %v227_v21 = vadd.f32 %v226_v19, %v225_v14 }
  0x75   :  { %318 = vlog2.f32 %v185_v18 }
  0x76   :  { %320 = vlog2.f32 %v227_v21 }
  0x7e   :  { %v317_v28 = vpop.eup %316 }
  0x7f   :  { %v319_v30 = vpop.eup %318  ;;  %v139_v31 = vmul.f32 0.6931472, %v317_v28 }
  0x80   :  { %v187_v33 = vmul.f32 0.6931472, %v319_v30  ;;  %v321_v37 = vpop.eup %320 }
  0x81   :  { %v140_v38 = vadd.f32 %v139_v31, %v531_v34  ;;  %v229_v40 = vmul.f32 0.6931472, %v321_v37 }
  0x82   :  { %v188_v39 = vadd.f32 %v187_v33, %v533_v35 }
  0x83   :  { %v154_v43 = vsub.f32 %v140_v38, %v153_v32  ;;  %v230_v45 = vadd.f32 %v229_v40, %v540_v41 }
  0x84   :  { %v197_v44 = vsub.f32 %v188_v39, %v196_v36 }
  0x85   :  { %v156_v46 = vsel %vm155_vm4, %v154_v43, 0.0  ;;  %v244_v48 = vsub.f32 %v230_v45, %v243_v42 }
  0x86   :  { %157 = vadd.xlane.f32.xlu1 %v156_v46  ;;  %v198_v47 = vsel %vm155_vm4, %v197_v44, 0.0 }
  0x87   :  { %199 = vadd.xlane.f32.xlu0 %v198_v47  ;;  %v245_v49 = vsel %vm155_vm4, %v244_v48, 0.0 }
  0xdc   :  { %v90_v50 = vpop.xlane.xlu0 %89 }
  0xe0   :  { %v94_v51 = vpop.xlane.xlu0 %93 }
  0xe1   :  { %v95_v52 = vsub.f32 %v90_v50, %v94_v51 }
  0xe3   :  { %v97_v34 = vmax.f32 %v95_v52, 0.0 }
  0xe5   :  { %v100_v53 = vsel %vm99_vm5, %v97_v34, 0.0 }
  0xe6   :  { %101 = vadd.xlane.f32.xlu1 %v100_v53 }
  0xea   :  { %246 = vadd.xlane.f32.xlu1 %v245_v49 }
 0x113   :  { %v158_v35 = vpop.xlane.xlu1 %157 }
 0x114   :  { %v200_v54 = vpop.xlane.xlu0 %199  ;;  %v159_v55 = vrot.slane %v158_v35, 4 }
 0x115   :  { %v201_v56 = vrot.slane %v200_v54, 4 }
 0x116   :  { %v160_v57 = vadd.f32 %v159_v55, %v158_v35 }
 0x117   :  { %v202_v41 = vadd.f32 %v201_v56, %v200_v54 }
 0x118   :  { %v161_v58 = vrot.slane %v160_v57, 2 }
 0x119   :  { %v203_v60 = vrot.slane %v202_v41, 2 }
 0x11a   :  { %v162_v0 = vadd.f32 %v161_v58, %v160_v57 }
 0x11b   :  { %v204_v1 = vadd.f32 %v203_v60, %v202_v41 }
 0x11c   :  { %v163_v6 = vrot.slane %v162_v0, 1 }
 0x11d   :  { %v205_v9 = vrot.slane %v204_v1, 1 }
 0x11e   :  { %v164_v12 = vadd.f32 %v163_v6, %v162_v0 }
 0x11f   :  { %v206_v13 = vadd.f32 %v205_v9, %v204_v1 }
 0x173   :  { %v102_v59 = vpop.xlane.xlu1 %101 }
 0x174   :  { %v103_v61 = vrot.slane %v102_v59, 4 }
 0x176   :  { %v104_v62 = vadd.f32 %v103_v61, %v102_v59 }
 0x177   :  { %v247_v63 = vpop.xlane.xlu1 %246 }
 0x178   :  { %v105_v2 = vrot.slane %v104_v62, 2  ;;  %v248_v3 = vrot.slane %v247_v63, 4 }
 0x17a   :  { %v249_v4 = vadd.f32 %v248_v3, %v247_v63  ;;  %v106_v5 = vadd.f32 %v105_v2, %v104_v62 }
 0x17c   :  { %v250_v7 = vrot.slane %v249_v4, 2  ;;  %v107_v8 = vrot.slane %v106_v5, 1 }
 0x17e   :  { %v251_v10 = vadd.f32 %v250_v7, %v249_v4  ;;  %v108_v11 = vadd.f32 %v107_v8, %v106_v5 }
 0x180   :  { %295 = vpush %v108_v11  ;;  %v252_v14 = vrot.slane %v251_v10, 1 }
 0x181   :  { %297 = vpush %v164_v12 }
 0x182   :  { %299 = vpush %v206_v13  ;;  %v253_v15 = vadd.f32 %v252_v14, %v251_v10 }
 0x184   :  { %301 = vpush %v253_v15 }
 0x1b1   :  { %s296_s4 = spop %295 }
 0x1b2   :  { %s266_s5 = smul.f32 0.125, %s296_s4  ;;  %s298_s22 = spop %297 }
 0x1b3   :  { %s300_s23 = spop %299 }
 0x1b4   :  { %268 = sst [smem:[#allocation11]] %s266_s5 }
 0x1b5   :  { %s208_s25 = sadd.f32 %s300_s23, %s298_s22  ;;  %s302_s26 = spop %301 }
 0x1b7   :  { %s255_s27 = sadd.f32 %s302_s26, %s208_s25 }
 0x1b9   :  { %s272_s28 = smul.f32 0.041666668, %s255_s27 }
 0x1bb   :  { %274 = sst [smem:[#allocation11 + $0x1]] %s272_s28 }
 0x1bc   :  { %419 = shalt.err (!%p416_p6)
}
 0x1bd   :  { %s434_s10 = smov [#allocation11]  }
 0x1be   :  { %282 = dma.smem_to_hbm %s434_s10, 16, %s570_s6, [#allocation5]  }
 0x1bf   :  { %426 = dma.done.wait [#allocation5], 16  }
 0x1c0   :  { %427 = vsyncadd [#allocation5], 4294967280 }
 0x1c1   :  { %286 = sfence }
 0x1c2   :  { %287 = vsyncpa [#allocation4], 1 }
 0x1c3   :  { %288 = vsyncpa [#allocation7], 1 }
 0x1c4   :  { %289 = vsyncpa [#allocation10], 1 }
 0x1c5   :  { %290 = vsyncpa [#allocation5], 1 }

</bundles_post_ra>
